<compile_context>
chip_gen: v5e
topology: v5e:2x2
jax: 0.10.0
libtpu: 0.0.40
codegen_flags: <defaults>
</compile_context>

<pallas_src>
import jax
import jax.numpy as jnp
from jax import lax
from jax.experimental import pallas as pl
from jax.experimental.pallas import tpu as pltpu

# ---- small T5 config ----
B = 2          # batch
S = 8          # seq len
D_MODEL = 32   # d_model
N_HEADS = 4    # num_heads
D_KV = 8       # key_value_proj_dim
INNER = N_HEADS * D_KV   # 32
EPS = 1e-6     # layer_norm_epsilon

T = B * S      # tokens handled in the single kernel invocation


def t5_self_attn_kernel(x_ref, wqkv_ref, wo_ref, o_ref):
    # x_ref:    [B, S, D_MODEL]     hidden states (f32)
    # wqkv_ref: [D_MODEL, 3*INNER]  fused [Wq | Wk | Wv] with the RMSNorm gain
    #                               pre-folded into its rows
    # wo_ref:   [INNER, D_MODEL]    output projection
    # o_ref:    [B, S, D_MODEL]     residual output
    x = x_ref[...].reshape(T, D_MODEL)            # merge leading dims (free)

    # --- T5LayerNorm (RMSNorm). Gain is folded into wqkv, so only rsqrt here;
    #     the residual below uses the raw x, so this is mathematically exact. ---
    var = jnp.mean(x * x, axis=-1, keepdims=True)
    normed = x * lax.rsqrt(var + EPS)             # [T, D_MODEL]

    # --- fused QKV projection: one MXU matmul instead of three ---
    qkv = jnp.dot(normed, wqkv_ref[...],
                  preferred_element_type=jnp.float32)          # [T, 3*INNER]

    # --- per-head attention (static unroll over 4 heads), batched over B with
    #     single-batch-dim 3-D einsums; head outputs accumulated straight into
    #     the Wo projection (== concat_heads(ctx) @ Wo). ---
    attn_out = jnp.zeros((T, D_MODEL), jnp.float32)
    for h in range(N_HEADS):
        lo = h * D_KV
        qh = qkv[:, lo:lo + D_KV].reshape(B, S, D_KV)
        kh = qkv[:, INNER + lo:INNER + lo + D_KV].reshape(B, S, D_KV)
        vh = qkv[:, 2 * INNER + lo:2 * INNER + lo + D_KV].reshape(B, S, D_KV)
        # T5 does NOT scale scores by 1/sqrt(d_kv); position_bias == 0 here.
        scores = jnp.einsum("bqd,bkd->bqk", qh, kh,
                            preferred_element_type=jnp.float32)     # [B, S, S]
        scores = scores - jnp.max(scores, axis=-1, keepdims=True)
        e = jnp.exp(scores)
        p = e * pl.reciprocal(jnp.sum(e, axis=-1, keepdims=True), approx=False)
        ctx = jnp.einsum("bqk,bkd->bqd", p, vh,
                         preferred_element_type=jnp.float32)        # [B, S, D_KV]
        # accumulate this head's slice of concat_heads(ctx) @ Wo
        # (wo row-slice is 8-sublane aligned -> free view).
        attn_out = attn_out + jnp.dot(ctx.reshape(T, D_KV),
                                      wo_ref[lo:lo + D_KV, :],
                                      preferred_element_type=jnp.float32)

    o_ref[...] = (x + attn_out).reshape(B, S, D_MODEL).astype(o_ref.dtype)


def prepare_t5_self_attention_weights(w_ln, wq, wk, wv, wo):
    """One-time weight preparation; hoisted entirely out of the per-call path.

    Fuses Wq|Wk|Wv into a single [D_MODEL, 3*INNER] matrix and folds the
    RMSNorm gain into its rows.  Call once at module init.
    """
    wqkv = jnp.concatenate([wq, wk, wv], axis=1).astype(jnp.float32)   # [D, 3*INNER]
    wqkv_eff = wqkv * w_ln.astype(jnp.float32).reshape(D_MODEL, 1)
    return wqkv_eff, wo.astype(jnp.float32)


@jax.jit
def t5_layer_self_attention(x, wqkv_eff, wo):
    # x: [B, S, D_MODEL]; wqkv_eff: [D_MODEL, 3*INNER]; wo: [INNER, D_MODEL]
    vmem = pltpu.MemorySpace.VMEM
    return pl.pallas_call(
        t5_self_attn_kernel,
        out_shape=jax.ShapeDtypeStruct((B, S, D_MODEL), x.dtype),
        in_specs=[
            pl.BlockSpec(memory_space=vmem),
            pl.BlockSpec(memory_space=vmem),
            pl.BlockSpec(memory_space=vmem),
        ],
        out_specs=pl.BlockSpec(memory_space=vmem),
    )(x, wqkv_eff, wo)


def reference(x, w_ln, wq, wk, wv, wo):
    # Pure-JAX reference of the same forward pass (unfused weights).
    xf = x.astype(jnp.float32)
    var = jnp.mean(xf * xf, axis=-1, keepdims=True)
    normed = xf * lax.rsqrt(var + EPS) * w_ln
    q = normed @ wq
    k = normed @ wk
    v = normed @ wv
    qh = q.reshape(B, S, N_HEADS, D_KV).transpose(0, 2, 1, 3)
    kh = k.reshape(B, S, N_HEADS, D_KV).transpose(0, 2, 1, 3)
    vh = v.reshape(B, S, N_HEADS, D_KV).transpose(0, 2, 1, 3)
    scores = jnp.einsum("bhqd,bhkd->bhqk", qh, kh)   # no scaling (T5)
    attn = jax.nn.softmax(scores, axis=-1)
    ctx = jnp.einsum("bhqk,bhkd->bhqd", attn, vh)
    ctx = ctx.transpose(0, 2, 1, 3).reshape(B, S, INNER)
    return xf + ctx @ wo


if __name__ == "__main__":
    key = jax.random.PRNGKey(0)
    kx, kln, kq, kk, kv, ko = jax.random.split(key, 6)

    x = jax.random.normal(kx, (B, S, D_MODEL), dtype=jnp.float32)
    # T5LayerNorm weight initializes to ones; perturb it slightly so the
    # folded-gain path is actually exercised by the check below.
    w_ln = jnp.ones((D_MODEL,), jnp.float32) \
        + 0.05 * jax.random.normal(kln, (D_MODEL,), dtype=jnp.float32)
    # Deterministic synthetic linear weights (already [in, out] layout).
    wq = jax.random.normal(kq, (D_MODEL, INNER), dtype=jnp.float32) * 0.05
    wk = jax.random.normal(kk, (D_MODEL, INNER), dtype=jnp.float32) * 0.05
    wv = jax.random.normal(kv, (D_MODEL, INNER), dtype=jnp.float32) * 0.05
    wo = jax.random.normal(ko, (INNER, D_MODEL), dtype=jnp.float32) * 0.05

    # One-time weight prep (init-time, NOT in the per-call path).
    wqkv_eff, wo_f32 = prepare_t5_self_attention_weights(w_ln, wq, wk, wv, wo)
    wqkv_eff = jax.block_until_ready(wqkv_eff)

    out = t5_layer_self_attention(x, wqkv_eff, wo_f32)
    out = jax.block_until_ready(out)

    ref = reference(x, w_ln, wq, wk, wv, wo)
    assert out.shape == (B, S, D_MODEL)
    # Small tolerance: differences come only from MXU default-precision matmuls
    # / accumulation order (softmax reciprocal is now exact).
    assert jnp.allclose(out, ref, rtol=1e-3, atol=1e-3), "mismatch vs reference"

    # TODO(synk): attention_mask / relative position bias / KV-cache paths are
    # not exercised (mask=None, has_relative_attention_bias=False, eval-mode dropout).
    print("KERNEL_OK")
</pallas_src>

<mosaic_0001>
module attributes {stable_mosaic.version = 11 : i64} {
  func.func @t5_self_attn_kernel(%arg0: memref<2x8x32xf32, #tpu.memory_space<vmem>>, %arg1: memref<32x96xf32, #tpu.memory_space<vmem>>, %arg2: memref<32x32xf32, #tpu.memory_space<vmem>>, %arg3: memref<2x8x32xf32, #tpu.memory_space<vmem>>) attributes {dimension_semantics = [], scalar_prefetch = 0 : i64, scratch_operands = 0 : i64, tpu.core_type = #tpu.core_type<tc>} {
    %c0 = arith.constant 0 : index
    %c0_0 = arith.constant 0 : index
    %c0_1 = arith.constant 0 : index
    %0 = vector.load %arg0[%c0, %c0_0, %c0_1] : memref<2x8x32xf32, #tpu.memory_space<vmem>>, vector<2x8x32xf32>
    %1 = vector.shape_cast %0 : vector<2x8x32xf32> to vector<16x32xf32>
    %2 = arith.mulf %1, %1 : vector<16x32xf32>
    %cst = arith.constant dense<0.000000e+00> : vector<16xf32>
    %3 = vector.multi_reduction <add>, %2, %cst [1] : vector<16x32xf32> to vector<16xf32>
    %4 = vector.shape_cast %3 : vector<16xf32> to vector<16x1xf32>
    %cst_2 = arith.constant 3.200000e+01 : f32
    %5 = vector.broadcast %cst_2 : f32 to vector<16x1xf32>
    %6 = arith.divf %4, %5 : vector<16x1xf32>
    %cst_3 = arith.constant 9.99999997E-7 : f32
    %7 = vector.broadcast %cst_3 : f32 to vector<16x1xf32>
    %8 = arith.addf %6, %7 : vector<16x1xf32>
    %9 = math.rsqrt %8 : vector<16x1xf32>
    %10 = vector.broadcast %9 : vector<16x1xf32> to vector<16x32xf32>
    %11 = arith.mulf %1, %10 : vector<16x32xf32>
    %c0_4 = arith.constant 0 : index
    %c0_5 = arith.constant 0 : index
    %12 = vector.load %arg1[%c0_4, %c0_5] : memref<32x96xf32, #tpu.memory_space<vmem>>, vector<32x96xf32>
    %cst_6 = arith.constant dense<0.000000e+00> : vector<16x96xf32>
    %13 = tpu.matmul %11, %12, %cst_6 {dimension_numbers = #tpu.dot_dimension_numbers<[1], [0], [0], [1], [0, 0, 1, 1], [], []>} : vector<16x32xf32>, vector<32x96xf32>, vector<16x96xf32> -> vector<16x96xf32>
    %cst_7 = arith.constant 0.000000e+00 : f32
    %14 = vector.broadcast %cst_7 : f32 to vector<16x32xf32>
    %15 = vector.extract_strided_slice %13 {offsets = [0, 0], sizes = [16, 8], strides = [1, 1]} : vector<16x96xf32> to vector<16x8xf32>
    %16 = vector.shape_cast %15 : vector<16x8xf32> to vector<2x8x8xf32>
    %17 = vector.extract_strided_slice %13 {offsets = [0, 32], sizes = [16, 8], strides = [1, 1]} : vector<16x96xf32> to vector<16x8xf32>
    %18 = vector.shape_cast %17 : vector<16x8xf32> to vector<2x8x8xf32>
    %19 = vector.extract_strided_slice %13 {offsets = [0, 64], sizes = [16, 8], strides = [1, 1]} : vector<16x96xf32> to vector<16x8xf32>
    %20 = vector.shape_cast %19 : vector<16x8xf32> to vector<2x8x8xf32>
    "tpu.trace_start"() <{level = 10 : i32, message = "bqd,bkd->bqk"}> : () -> ()
    %cst_8 = arith.constant dense<0.000000e+00> : vector<2x8x8xf32>
    %21 = tpu.matmul %16, %18, %cst_8 {dimension_numbers = #tpu.dot_dimension_numbers<[2], [2], [1], [1], [0, 0, 0, 1, 1, 1], [0], [0]>} : vector<2x8x8xf32>, vector<2x8x8xf32>, vector<2x8x8xf32> -> vector<2x8x8xf32>
    "tpu.trace_stop"() : () -> ()
    %cst_9 = arith.constant dense<0xFF800000> : vector<2x8xf32>
    %22 = vector.multi_reduction <maximumf>, %21, %cst_9 [2] : vector<2x8x8xf32> to vector<2x8xf32>
    %23 = vector.shape_cast %22 : vector<2x8xf32> to vector<2x8x1xf32>
    %24 = vector.broadcast %23 : vector<2x8x1xf32> to vector<2x8x8xf32>
    %25 = arith.subf %21, %24 : vector<2x8x8xf32>
    %26 = math.exp %25 : vector<2x8x8xf32>
    %cst_10 = arith.constant dense<0.000000e+00> : vector<2x8xf32>
    %27 = vector.multi_reduction <add>, %26, %cst_10 [2] : vector<2x8x8xf32> to vector<2x8xf32>
    %28 = vector.shape_cast %27 : vector<2x8xf32> to vector<2x8x1xf32>
    %29 = tpu.reciprocal %28 : vector<2x8x1xf32> -> vector<2x8x1xf32>
    %30 = vector.broadcast %29 : vector<2x8x1xf32> to vector<2x8x8xf32>
    %31 = arith.mulf %26, %30 : vector<2x8x8xf32>
    "tpu.trace_start"() <{level = 10 : i32, message = "bqk,bkd->bqd"}> : () -> ()
    %cst_11 = arith.constant dense<0.000000e+00> : vector<2x8x8xf32>
    %32 = tpu.matmul %31, %20, %cst_11 {dimension_numbers = #tpu.dot_dimension_numbers<[2], [1], [1], [2], [0, 0, 0, 1, 1, 2], [0], [0]>} : vector<2x8x8xf32>, vector<2x8x8xf32>, vector<2x8x8xf32> -> vector<2x8x8xf32>
    "tpu.trace_stop"() : () -> ()
    %33 = vector.shape_cast %32 : vector<2x8x8xf32> to vector<16x8xf32>
    %c0_12 = arith.constant 0 : index
    %c0_13 = arith.constant 0 : index
    %34 = vector.load %arg2[%c0_12, %c0_13] : memref<32x32xf32, #tpu.memory_space<vmem>>, vector<8x32xf32>
    %cst_14 = arith.constant dense<0.000000e+00> : vector<16x32xf32>
    %35 = tpu.matmul %33, %34, %cst_14 {dimension_numbers = #tpu.dot_dimension_numbers<[1], [0], [0], [1], [0, 0, 1, 1], [], []>} : vector<16x8xf32>, vector<8x32xf32>, vector<16x32xf32> -> vector<16x32xf32>
    %36 = arith.addf %14, %35 : vector<16x32xf32>
    %37 = vector.extract_strided_slice %13 {offsets = [0, 8], sizes = [16, 8], strides = [1, 1]} : vector<16x96xf32> to vector<16x8xf32>
    %38 = vector.shape_cast %37 : vector<16x8xf32> to vector<2x8x8xf32>
    %39 = vector.extract_strided_slice %13 {offsets = [0, 40], sizes = [16, 8], strides = [1, 1]} : vector<16x96xf32> to vector<16x8xf32>
    %40 = vector.shape_cast %39 : vector<16x8xf32> to vector<2x8x8xf32>
    %41 = vector.extract_strided_slice %13 {offsets = [0, 72], sizes = [16, 8], strides = [1, 1]} : vector<16x96xf32> to vector<16x8xf32>
    %42 = vector.shape_cast %41 : vector<16x8xf32> to vector<2x8x8xf32>
    "tpu.trace_start"() <{level = 10 : i32, message = "bqd,bkd->bqk"}> : () -> ()
    %cst_15 = arith.constant dense<0.000000e+00> : vector<2x8x8xf32>
    %43 = tpu.matmul %38, %40, %cst_15 {dimension_numbers = #tpu.dot_dimension_numbers<[2], [2], [1], [1], [0, 0, 0, 1, 1, 1], [0], [0]>} : vector<2x8x8xf32>, vector<2x8x8xf32>, vector<2x8x8xf32> -> vector<2x8x8xf32>
    "tpu.trace_stop"() : () -> ()
    %cst_16 = arith.constant dense<0xFF800000> : vector<2x8xf32>
    %44 = vector.multi_reduction <maximumf>, %43, %cst_16 [2] : vector<2x8x8xf32> to vector<2x8xf32>
    %45 = vector.shape_cast %44 : vector<2x8xf32> to vector<2x8x1xf32>
    %46 = vector.broadcast %45 : vector<2x8x1xf32> to vector<2x8x8xf32>
    %47 = arith.subf %43, %46 : vector<2x8x8xf32>
    %48 = math.exp %47 : vector<2x8x8xf32>
    %cst_17 = arith.constant dense<0.000000e+00> : vector<2x8xf32>
    %49 = vector.multi_reduction <add>, %48, %cst_17 [2] : vector<2x8x8xf32> to vector<2x8xf32>
    %50 = vector.shape_cast %49 : vector<2x8xf32> to vector<2x8x1xf32>
    %51 = tpu.reciprocal %50 : vector<2x8x1xf32> -> vector<2x8x1xf32>
    %52 = vector.broadcast %51 : vector<2x8x1xf32> to vector<2x8x8xf32>
    %53 = arith.mulf %48, %52 : vector<2x8x8xf32>
    "tpu.trace_start"() <{level = 10 : i32, message = "bqk,bkd->bqd"}> : () -> ()
    %cst_18 = arith.constant dense<0.000000e+00> : vector<2x8x8xf32>
    %54 = tpu.matmul %53, %42, %cst_18 {dimension_numbers = #tpu.dot_dimension_numbers<[2], [1], [1], [2], [0, 0, 0, 1, 1, 2], [0], [0]>} : vector<2x8x8xf32>, vector<2x8x8xf32>, vector<2x8x8xf32> -> vector<2x8x8xf32>
    "tpu.trace_stop"() : () -> ()
    %55 = vector.shape_cast %54 : vector<2x8x8xf32> to vector<16x8xf32>
    %c8 = arith.constant 8 : index
    %c0_19 = arith.constant 0 : index
    %56 = vector.load %arg2[%c8, %c0_19] : memref<32x32xf32, #tpu.memory_space<vmem>>, vector<8x32xf32>
    %cst_20 = arith.constant dense<0.000000e+00> : vector<16x32xf32>
    %57 = tpu.matmul %55, %56, %cst_20 {dimension_numbers = #tpu.dot_dimension_numbers<[1], [0], [0], [1], [0, 0, 1, 1], [], []>} : vector<16x8xf32>, vector<8x32xf32>, vector<16x32xf32> -> vector<16x32xf32>
    %58 = arith.addf %36, %57 : vector<16x32xf32>
    %59 = vector.extract_strided_slice %13 {offsets = [0, 16], sizes = [16, 8], strides = [1, 1]} : vector<16x96xf32> to vector<16x8xf32>
    %60 = vector.shape_cast %59 : vector<16x8xf32> to vector<2x8x8xf32>
    %61 = vector.extract_strided_slice %13 {offsets = [0, 48], sizes = [16, 8], strides = [1, 1]} : vector<16x96xf32> to vector<16x8xf32>
    %62 = vector.shape_cast %61 : vector<16x8xf32> to vector<2x8x8xf32>
    %63 = vector.extract_strided_slice %13 {offsets = [0, 80], sizes = [16, 8], strides = [1, 1]} : vector<16x96xf32> to vector<16x8xf32>
    %64 = vector.shape_cast %63 : vector<16x8xf32> to vector<2x8x8xf32>
    "tpu.trace_start"() <{level = 10 : i32, message = "bqd,bkd->bqk"}> : () -> ()
    %cst_21 = arith.constant dense<0.000000e+00> : vector<2x8x8xf32>
    %65 = tpu.matmul %60, %62, %cst_21 {dimension_numbers = #tpu.dot_dimension_numbers<[2], [2], [1], [1], [0, 0, 0, 1, 1, 1], [0], [0]>} : vector<2x8x8xf32>, vector<2x8x8xf32>, vector<2x8x8xf32> -> vector<2x8x8xf32>
    "tpu.trace_stop"() : () -> ()
    %cst_22 = arith.constant dense<0xFF800000> : vector<2x8xf32>
    %66 = vector.multi_reduction <maximumf>, %65, %cst_22 [2] : vector<2x8x8xf32> to vector<2x8xf32>
    %67 = vector.shape_cast %66 : vector<2x8xf32> to vector<2x8x1xf32>
    %68 = vector.broadcast %67 : vector<2x8x1xf32> to vector<2x8x8xf32>
    %69 = arith.subf %65, %68 : vector<2x8x8xf32>
    %70 = math.exp %69 : vector<2x8x8xf32>
    %cst_23 = arith.constant dense<0.000000e+00> : vector<2x8xf32>
    %71 = vector.multi_reduction <add>, %70, %cst_23 [2] : vector<2x8x8xf32> to vector<2x8xf32>
    %72 = vector.shape_cast %71 : vector<2x8xf32> to vector<2x8x1xf32>
    %73 = tpu.reciprocal %72 : vector<2x8x1xf32> -> vector<2x8x1xf32>
    %74 = vector.broadcast %73 : vector<2x8x1xf32> to vector<2x8x8xf32>
    %75 = arith.mulf %70, %74 : vector<2x8x8xf32>
    "tpu.trace_start"() <{level = 10 : i32, message = "bqk,bkd->bqd"}> : () -> ()
    %cst_24 = arith.constant dense<0.000000e+00> : vector<2x8x8xf32>
    %76 = tpu.matmul %75, %64, %cst_24 {dimension_numbers = #tpu.dot_dimension_numbers<[2], [1], [1], [2], [0, 0, 0, 1, 1, 2], [0], [0]>} : vector<2x8x8xf32>, vector<2x8x8xf32>, vector<2x8x8xf32> -> vector<2x8x8xf32>
    "tpu.trace_stop"() : () -> ()
    %77 = vector.shape_cast %76 : vector<2x8x8xf32> to vector<16x8xf32>
    %c16 = arith.constant 16 : index
    %c0_25 = arith.constant 0 : index
    %78 = vector.load %arg2[%c16, %c0_25] : memref<32x32xf32, #tpu.memory_space<vmem>>, vector<8x32xf32>
    %cst_26 = arith.constant dense<0.000000e+00> : vector<16x32xf32>
    %79 = tpu.matmul %77, %78, %cst_26 {dimension_numbers = #tpu.dot_dimension_numbers<[1], [0], [0], [1], [0, 0, 1, 1], [], []>} : vector<16x8xf32>, vector<8x32xf32>, vector<16x32xf32> -> vector<16x32xf32>
    %80 = arith.addf %58, %79 : vector<16x32xf32>
    %81 = vector.extract_strided_slice %13 {offsets = [0, 24], sizes = [16, 8], strides = [1, 1]} : vector<16x96xf32> to vector<16x8xf32>
    %82 = vector.shape_cast %81 : vector<16x8xf32> to vector<2x8x8xf32>
    %83 = vector.extract_strided_slice %13 {offsets = [0, 56], sizes = [16, 8], strides = [1, 1]} : vector<16x96xf32> to vector<16x8xf32>
    %84 = vector.shape_cast %83 : vector<16x8xf32> to vector<2x8x8xf32>
    %85 = vector.extract_strided_slice %13 {offsets = [0, 88], sizes = [16, 8], strides = [1, 1]} : vector<16x96xf32> to vector<16x8xf32>
    %86 = vector.shape_cast %85 : vector<16x8xf32> to vector<2x8x8xf32>
    "tpu.trace_start"() <{level = 10 : i32, message = "bqd,bkd->bqk"}> : () -> ()
    %cst_27 = arith.constant dense<0.000000e+00> : vector<2x8x8xf32>
    %87 = tpu.matmul %82, %84, %cst_27 {dimension_numbers = #tpu.dot_dimension_numbers<[2], [2], [1], [1], [0, 0, 0, 1, 1, 1], [0], [0]>} : vector<2x8x8xf32>, vector<2x8x8xf32>, vector<2x8x8xf32> -> vector<2x8x8xf32>
    "tpu.trace_stop"() : () -> ()
    %cst_28 = arith.constant dense<0xFF800000> : vector<2x8xf32>
    %88 = vector.multi_reduction <maximumf>, %87, %cst_28 [2] : vector<2x8x8xf32> to vector<2x8xf32>
    %89 = vector.shape_cast %88 : vector<2x8xf32> to vector<2x8x1xf32>
    %90 = vector.broadcast %89 : vector<2x8x1xf32> to vector<2x8x8xf32>
    %91 = arith.subf %87, %90 : vector<2x8x8xf32>
    %92 = math.exp %91 : vector<2x8x8xf32>
    %cst_29 = arith.constant dense<0.000000e+00> : vector<2x8xf32>
    %93 = vector.multi_reduction <add>, %92, %cst_29 [2] : vector<2x8x8xf32> to vector<2x8xf32>
    %94 = vector.shape_cast %93 : vector<2x8xf32> to vector<2x8x1xf32>
    %95 = tpu.reciprocal %94 : vector<2x8x1xf32> -> vector<2x8x1xf32>
    %96 = vector.broadcast %95 : vector<2x8x1xf32> to vector<2x8x8xf32>
    %97 = arith.mulf %92, %96 : vector<2x8x8xf32>
    "tpu.trace_start"() <{level = 10 : i32, message = "bqk,bkd->bqd"}> : () -> ()
    %cst_30 = arith.constant dense<0.000000e+00> : vector<2x8x8xf32>
    %98 = tpu.matmul %97, %86, %cst_30 {dimension_numbers = #tpu.dot_dimension_numbers<[2], [1], [1], [2], [0, 0, 0, 1, 1, 2], [0], [0]>} : vector<2x8x8xf32>, vector<2x8x8xf32>, vector<2x8x8xf32> -> vector<2x8x8xf32>
    "tpu.trace_stop"() : () -> ()
    %99 = vector.shape_cast %98 : vector<2x8x8xf32> to vector<16x8xf32>
    %c24 = arith.constant 24 : index
    %c0_31 = arith.constant 0 : index
    %100 = vector.load %arg2[%c24, %c0_31] : memref<32x32xf32, #tpu.memory_space<vmem>>, vector<8x32xf32>
    %cst_32 = arith.constant dense<0.000000e+00> : vector<16x32xf32>
    %101 = tpu.matmul %99, %100, %cst_32 {dimension_numbers = #tpu.dot_dimension_numbers<[1], [0], [0], [1], [0, 0, 1, 1], [], []>} : vector<16x8xf32>, vector<8x32xf32>, vector<16x32xf32> -> vector<16x32xf32>
    %102 = arith.addf %80, %101 : vector<16x32xf32>
    %103 = arith.addf %1, %102 : vector<16x32xf32>
    %104 = vector.shape_cast %103 : vector<16x32xf32> to vector<2x8x32xf32>
    %c0_33 = arith.constant 0 : index
    %c0_34 = arith.constant 0 : index
    %c0_35 = arith.constant 0 : index
    %105 = vector.load %arg3[%c0_33, %c0_34, %c0_35] : memref<2x8x32xf32, #tpu.memory_space<vmem>>, vector<2x8x32xf32>
    tpu.vector_store %arg3[%c0_33, %c0_34, %c0_35], %104 {strides = array<i32>} : memref<2x8x32xf32, #tpu.memory_space<vmem>>, vector<2x8x32xf32>,
    return
  }
}

</mosaic_0001>

<bundles_post_ra>
// kernel: t5_layer_self_attention.1
= control target key start
LH: loop header
LB: loop body
LE: loop exit
PB: predicated region body
PF: predicated region fallthrough
CT: control target
= control target key end

     0   :  { %8 = vsyncpa [#allocation3], 0  ;;  %s1286_s0 = inlined_call_operand.hbm [shape: f32[2,8,32], index: 0, kind: input, shape index: {}]   ;;  %s1287_s1 = inlined_call_operand.hbm [shape: f32[32,96], index: 1, kind: input, shape index: {}]   ;;  %s1288_s2 = inlined_call_operand.hbm [shape: f32[32,32], index: 2, kind: input, shape index: {}]   ;;  %s1289_s3 = inlined_call_operand.hbm [shape: f32[2,8,32], index: 3, kind: output, shape index: {}]  }
   0x1   :  { %9 = vsyncpa [#allocation6], 0 }
   0x2   :  { %10 = vsyncpa [#allocation4], 0  ;;  %s28_s14 = sshll.u32 %s1287_s1, 4  ;;  %s1102_s15 = smov [#allocation5]   ;;  %s29_s14 = int_to_ptr.hbm [resolvable:$true] %s28_s14 }
   0x3   :  { %s30_s16 = sshll.u32 %s1102_s15, 4  ;;  %s15_s19 = sshll.u32 %s1286_s0, 4  ;;  %s31_s16 = int_to_ptr.vmem [resolvable:$true] %s30_s16  ;;  %s16_s19 = int_to_ptr.hbm [resolvable:$true] %s15_s19 }
   0x4   :  { %s1103_s20 = smov 128   ;;  %s1104_s21 = smov 8  }
   0x5   :  { %36 = dma.hbm_to_vmem [thread:$0]  %s29_s14, 512, %s31_s16, [#allocation6], %s1103_s20, %s1103_s20, %s1104_s21  }
   0x6   :  { %s1105_s22 = smov [#allocation2]   ;;  %s41_s1 = sshll.u32 %s1288_s2, 4  ;;  %s42_s1 = int_to_ptr.hbm [resolvable:$true] %s41_s1 }
   0x7   :  { %s17_s23 = sshll.u32 %s1105_s22, 4  ;;  %s1106_s0 = smov [#allocation7]   ;;  %s18_s23 = int_to_ptr.vmem [resolvable:$true] %s17_s23 }
   0x8   :  { %23 = dma.hbm_to_vmem [thread:$0]  %s16_s19, 256, %s18_s23, [#allocation3], %s1103_s20, %s1103_s20, %s1104_s21  }
   0x9   :  { %s43_s26 = sshll.u32 %s1106_s0, 4  ;;  %s44_s26 = int_to_ptr.vmem [resolvable:$true] %s43_s26 }
   0xa   :  { %49 = dma.hbm_to_vmem [thread:$0]  %s42_s1, 512, %s44_s26, [#allocation6], %s1103_s20, %s1103_s20, %s1104_s21  }
   0xb   :  { %1096 = dma.done.wait [#allocation3], 256  }
   0xc   :  { %1097 = vsyncadd [#allocation3], 4294967040 }
   0xd   :  { %1098 = dma.done.wait [#allocation6], 1024  }
   0xe   :  { %1099 = vsyncadd [#allocation6], 4294966272  ;;  %v1158_v0 = vld [vmem:[#allocation2] sm:$0xff]  ;;  %vm66_vm0 = vcmask 261120   ;;  %v1160_v1 = vld [vmem:[#allocation2 + $0x8] sm:$0xff]  ;;  %v1107_v6 = vmov 32.0  }
   0xf   :  { %v64_v2 = vmul.f32 %v1158_v0, %v1158_v0  ;;  %v65_v3 = vmul.f32 %v1160_v1, %v1160_v1  ;;  %962 = vrcp.f32 %v1107_v6  ;;  %v109_v9 = vld [vmem:[#allocation5 + $0x18] sm:$0xff]  ;;  %v108_v11 = vld [vmem:[#allocation5 + $0x10] sm:$0xff]  ;;  %v107_v12 = vld [vmem:[#allocation5 + $0x8] sm:$0xff]  ;;  %s1108_s2 = smov 96   ;;  %s1109_s27 = smov 88   ;;  %vm142_vm8 = vcmask 64512  }
  0x10   :  { %128 = vmatpush.msra.mxu0 %v109_v9  ;;  %v106_v13 = vld [vmem:[#allocation5] sm:$0xff]  ;;  %s1110_s28 = smov 120   ;;  %s1111_s29 = smov 64  }
  0x11   :  { %v67_v4 = vsel %vm66_vm0, %v64_v2, 0.0  ;;  %v70_v5 = vsel %vm66_vm0, %v65_v3, 0.0  ;;  %s1112_s30 = smov 112   ;;  %s1113_s4 = smov 56  }
  0x12   :  { %68 = vadd.xlane.f32.xlu0 %v67_v4  ;;  %71 = vadd.xlane.f32.xlu1 %v70_v5  ;;  %s1114_s5 = smov 80   ;;  %s1115_s6 = smov 72  }
  0x13   :  { %129 = vmatpush.msra.mxu0 %v108_v11  ;;  %s1116_s7 = smov 104   ;;  %s1117_s8 = smov 48  }
  0x14   :  { %s1118_s9 = smov 40   ;;  %s1119_s10 = smov [#allocation8]  }
  0x15   :  { %v963_v7 = vpop.eup %962  ;;  %130 = vmatpush.msra.mxu0 %v107_v12  ;;  %s894_s11 = sshll.u32 %s1119_s10, 4  ;;  %s896_s14 = sshll.u32 %s1289_s3, 4  ;;  %s895_s11 = int_to_ptr.vmem [resolvable:$true] %s894_s11  ;;  %s897_s14 = int_to_ptr.hbm [resolvable:$true] %s896_s14 }
  0x16   :  { %v74_v8 = vmul.f32 32.0, %v963_v7  ;;  %vm78_vm1 = vweird.f32 %v963_v7 }
  0x17   :  { %131 = vmatpush.msra.mxu0 %v106_v13  ;;  %v294_v13 = vld [vmem:[#allocation7] sm:$0xff] }
  0x18   :  { %v75_v10 = vsub.f32 1.0, %v74_v8 }
  0x19   :  { %502 = vmatpush.msrb.mxu0 %v294_v13 }
  0x1a   :  { %v76_v14 = vmul.f32 %v963_v7, %v75_v10 }
  0x1c   :  { %v77_v15 = vadd.f32 %v963_v7, %v76_v14 }
  0x1e   :  { %v79_v16 = vsel %vm78_vm1, %v963_v7, %v77_v15 }
  0x85   :  { %v69_v17 = vpop.xlane.xlu0 %68  ;;  %v72_v18 = vpop.xlane.xlu1 %71 }
  0x86   :  { %v80_v19 = vmul.f32 %v79_v16, %v69_v17  ;;  %v81_v20 = vmul.f32 %v79_v16, %v72_v18 }
  0x88   :  { %v82_v21 = vadd.f32 1e-06, %v80_v19  ;;  %v83_v22 = vadd.f32 1e-06, %v81_v20 }
  0x8a   :  { %964 = vrsqrt.f32 %v82_v21  ;;  %vm90_vm3 = vweird.f32 %v82_v21  ;;  %vm100_vm4 = vweird.f32 %v83_v22 }
  0x8b   :  { %966 = vrsqrt.f32 %v83_v22 }
  0x90   :  { %v965_v23 = vpop.eup %964 }
  0x91   :  { %v967_v24 = vpop.eup %966  ;;  %v85_v25 = vmul.f32 %v965_v23, %v82_v21  ;;  %vm91_vm2 = vweird.f32 %v965_v23 }
  0x92   :  { %v95_v26 = vmul.f32 %v967_v24, %v83_v22  ;;  %vm101_vm5 = vweird.f32 %v967_v24  ;;  %vm92_vm6 = vmor %vm90_vm3, %vm91_vm2 }
  0x93   :  { %v86_v27 = vmul.f32 %v965_v23, %v85_v25  ;;  %vm102_vm7 = vmor %vm100_vm4, %vm101_vm5 }
  0x94   :  { %v96_v28 = vmul.f32 %v967_v24, %v95_v26 }
  0x95   :  { %v87_v29 = vmul.f32 0.5, %v86_v27 }
  0x96   :  { %v97_v30 = vmul.f32 0.5, %v96_v28 }
  0x97   :  { %v88_v31 = vsub.f32 1.5, %v87_v29 }
  0x98   :  { %v98_v32 = vsub.f32 1.5, %v97_v30 }
  0x99   :  { %v89_v33 = vmul.f32 %v965_v23, %v88_v31 }
  0x9a   :  { %v99_v35 = vmul.f32 %v967_v24, %v98_v32 }
  0x9b   :  { %v93_v34 = vsel %vm92_vm6, %v965_v23, %v89_v33 }
  0x9c   :  { %v104_v36 = vmul.f32 %v93_v34, %v1158_v0  ;;  %v103_v37 = vsel %vm102_vm7, %v967_v24, %v99_v35 }
  0x9d   :  { %v105_v38 = vmul.f32 %v103_v37, %v1160_v1 }
  0x9e   :  { %910 = vmatmul.msk.f32.vlgmr.msra.gmra.mxu0 %vm66_vm0, %v104_v36 }
  0xa6   :  { %911 = vmatmul.msk.f32.gmra.mxu0 %vm66_vm0, %v105_v38 }
 0x11b   :  { %v1172_v39 = vpop.f32.mrf.mxu0 }
 0x11c   :  { %140 = vrot.lane.b32.xlu0 %v1172_v39, %s1108_s2 }
 0x123   :  { %v1175_v40 = vpop.f32.mrf.mxu0 }
 0x124   :  { %297 = vrot.lane.b32.xlu0 %v1172_v39, %s1109_s27  ;;  %168 = vrot.lane.b32.xlu2 %v1175_v40, %s1108_s2 }
 0x17e   :  { %v169_v41 = vpop.permute.xlu2 %168 }
 0x17f   :  { %914 = vmatpush.xpose.msk.msra.mxu2 %vm142_vm8, %v169_v41 }
 0x182   :  { %915 = vmatmul.msk.f32.vlgmr.msra.gmra.mxu2 %vm142_vm8, %v1175_v40 }
 0x18e   :  { %v141_v42 = vpop.permute.xlu0 %140 }
 0x18f   :  { %912 = vmatpush.xpose.msk.msra.mxu1 %vm142_vm8, %v141_v42 }
 0x192   :  { %913 = vmatmul.msk.f32.vlgmr.msra.gmra.mxu1 %vm142_vm8, %v1172_v39 }
 0x196   :  { %v298_v47 = vpop.permute.xlu0 %297 }
 0x205   :  { %v191_v43 = vpop.f32.mrf.mxu2 }
 0x206   :  { %v197_v44 = vsel %vm142_vm8, %v191_v43, -inf }
 0x207   :  { %198 = vmax.xlane.f32.xlu0 %v197_v44 }
 0x20f   :  { %v164_v45 = vpop.f32.mrf.mxu1 }
 0x210   :  { %v194_v46 = vsel %vm142_vm8, %v164_v45, -inf }
 0x211   :  { %195 = vmax.xlane.f32.xlu1 %v194_v46 }
 0x21b   :  { %323 = vrot.lane.b32.xlu0 %v1175_v40, %s1110_s28 }
 0x22a   :  { %242 = vrot.lane.b32.xlu1 %v1172_v39, %s1111_s29 }
 0x27a   :  { %v199_v48 = vpop.xlane.xlu0 %198 }
 0x27b   :  { %v201_v49 = vsub.f32 %v191_v43, %v199_v48 }
 0x27d   :  { %v204_v50 = vmul.f32 1.442695, %v201_v49 }
 0x27f   :  { %968 = vpow2.f32 %v204_v50 }
 0x284   :  { %v196_v51 = vpop.xlane.xlu1 %195 }
 0x285   :  { %v1191_v52 = vpop.eup %968  ;;  %v200_v53 = vsub.f32 %v164_v45, %v196_v51 }
 0x286   :  { %v209_v54 = vsel %vm142_vm8, %v1191_v52, 0.0 }
 0x287   :  { %v202_v55 = vmul.f32 1.442695, %v200_v53  ;;  %210 = vadd.xlane.f32.xlu1 %v209_v54 }
 0x289   :  { %970 = vpow2.f32 %v202_v55 }
 0x28d   :  { %v324_v9 = vpop.permute.xlu0 %323 }
 0x28f   :  { %v971_v56 = vpop.eup %970 }
 0x290   :  { %v206_v57 = vsel %vm142_vm8, %v971_v56, 0.0 }
 0x291   :  { %207 = vadd.xlane.f32.xlu2 %v206_v57 }
 0x29c   :  { %v243_v58 = vpop.permute.xlu1 %242 }
 0x29d   :  { %263 = vmatpush.msrb.mxu1 %v243_v58 }
 0x29f   :  { %918 = vmatpush.xpose.msk.msra.mxu1 %vm142_vm8, %v298_v47 }
 0x2a0   :  { %325 = vrot.lane.b32.xlu1 %v1175_v40, %s1109_s27 }
 0x2a8   :  { %510 = vrot.lane.b32.xlu1 %v1172_v39, %s1112_s30 }
 0x2a9   :  { %295 = vrot.lane.b32.xlu2 %v1172_v39, %s1110_s28 }
 0x2fa   :  { %v211_v60 = vpop.xlane.xlu1 %210 }
 0x2fb   :  { %vm231_vm13 = vweird.f32 %v211_v60  ;;  %v237_v23 = vand.u32 2147483648, %v211_v60  ;;  %v235_v25 = vand.u32 2147483647, %v211_v60 }
 0x2fd   :  { %v238_v27 = vor.u32 1.1754944e-38, %v237_v23  ;;  %vm236_vm1 = vcmp.eq.f32.partialorder %v235_v25, 8.507059e+37 }
 0x304   :  { %v208_v59 = vpop.xlane.xlu2 %207 }
 0x305   :  { %972 = vrcp.f32 %v208_v59  ;;  %v223_v2 = vand.u32 2147483648, %v208_v59  ;;  %v221_v4 = vand.u32 2147483647, %v208_v59  ;;  %vm217_vm10 = vweird.f32 %v208_v59 }
 0x306   :  { %974 = vrcp.f32 %v211_v60 }
 0x307   :  { %v224_v7 = vor.u32 1.1754944e-38, %v223_v2  ;;  %vm222_vm12 = vcmp.eq.f32.partialorder %v221_v4, 8.507059e+37 }
 0x30b   :  { %v973_v61 = vpop.eup %972 }
 0x30c   :  { %v213_v62 = vmul.f32 %v973_v61, %v208_v59  ;;  %vm218_vm9 = vweird.f32 %v973_v61  ;;  %v296_v12 = vpop.permute.xlu2 %295  ;;  %v975_v19 = vpop.eup %974 }
 0x30d   :  { %vm219_vm11 = vmor %vm217_vm10, %vm218_vm9  ;;  %v227_v20 = vmul.f32 %v975_v19, %v211_v60  ;;  %vm232_vm14 = vweird.f32 %v975_v19 }
 0x30e   :  { %v214_v63 = vsub.f32 1.0, %v213_v62  ;;  %vm233_vm15 = vmor %vm231_vm13, %vm232_vm14  ;;  %v451_v62 = vld [vmem:[#allocation7 + $0x8] sm:$0xff] }
 0x30f   :  { %v228_v21 = vsub.f32 1.0, %v227_v20 }
 0x310   :  { %v215_v3 = vmul.f32 %v973_v61, %v214_v63 }
 0x311   :  { %v229_v22 = vmul.f32 %v975_v19, %v228_v21 }
 0x312   :  { %v216_v5 = vadd.f32 %v973_v61, %v215_v3  ;;  %v326_v6 = vpop.permute.xlu1 %325 }
 0x313   :  { %920 = vmatpush.xpose.msk.msrb.mxu2 %vm142_vm8, %v326_v6  ;;  %v230_v24 = vadd.f32 %v975_v19, %v229_v22 }
 0x314   :  { %v220_v8 = vsel %vm219_vm11, %v973_v61, %v216_v5 }
 0x315   :  { %v225_v10 = vsel %vm222_vm12, %v224_v7, %v220_v8  ;;  %v234_v29 = vsel %vm233_vm15, %v975_v19, %v230_v24 }
 0x316   :  { %921 = vmatmul.msk.f32.vlgmr.msrb.gmra.mxu2 %vm142_vm8, %v324_v9  ;;  %v240_v11 = vmul.f32 %v971_v56, %v225_v10  ;;  %v239_v31 = vsel %vm236_vm1, %v238_v27, %v234_v29 }
 0x317   :  { %v241_v33 = vmul.f32 %v1191_v52, %v239_v31  ;;  %473 = vmatpush.msra.mxu2 %v451_v62 }
 0x318   :  { %916 = vmatmul.msk.f32.vlgmr.msrb.gmra.mxu1 %vm142_vm8, %v240_v11 }
 0x31a   :  { %v511_v58 = vpop.permute.xlu1 %510 }
 0x320   :  { %919 = vmatmul.msk.f32.vlgmr.msra.gmra.mxu1 %vm142_vm8, %v296_v12 }
 0x395   :  { %v265_v14 = vpop.f32.mrf.mxu1 }
 0x396   :  { %926 = vmatmul.msk.f32.vlgmr.msrb.gmra.mxu0 %vm142_vm8, %v265_v14 }
 0x399   :  { %v348_v17 = vpop.f32.mrf.mxu2 }
 0x39a   :  { %v354_v18 = vsel %vm142_vm8, %v348_v17, -inf }
 0x39d   :  { %v320_v15 = vpop.f32.mrf.mxu1 }
 0x39e   :  { %v351_v16 = vsel %vm142_vm8, %v320_v15, -inf }
 0x39f   :  { %352 = vmax.xlane.f32.xlu2 %v351_v16 }
 0x3b7   :  { %268 = vrot.lane.b32.xlu2 %v1175_v40, %s1111_s29 }
 0x3bf   :  { %399 = vrot.lane.b32.xlu2 %v1172_v39, %s1113_s4 }
 0x3e8   :  { %355 = vmax.xlane.f32.xlu2 %v354_v18 }
 0x400   :  { %538 = vrot.lane.b32.xlu2 %v1175_v40, %s1112_s30 }
 0x412   :  { %v353_v26 = vpop.xlane.xlu2 %352 }
 0x413   :  { %v357_v28 = vsub.f32 %v320_v15, %v353_v26 }
 0x415   :  { %v359_v30 = vmul.f32 1.442695, %v357_v28 }
 0x417   :  { %976 = vpow2.f32 %v359_v30 }
 0x41a   :  { %v269_v32 = vpop.permute.xlu2 %268 }
 0x41b   :  { %289 = vmatpush.msra.mxu3 %v269_v32 }
 0x41c   :  { %917 = vmatmul.msk.f32.vlgmr.msra.gmra.mxu3 %vm142_vm8, %v241_v33 }
 0x41d   :  { %v977_v34 = vpop.eup %976 }
 0x41e   :  { %v363_v35 = vsel %vm142_vm8, %v977_v34, 0.0 }
 0x41f   :  { %364 = vadd.xlane.f32.xlu0 %v363_v35 }
 0x422   :  { %v400_v36 = vpop.permute.xlu2 %399 }
 0x423   :  { %420 = vmatpush.msrb.mxu3 %v400_v36 }
 0x433   :  { %512 = vrot.lane.b32.xlu0 %v1172_v39, %s1114_s5 }
 0x45b   :  { %v356_v37 = vpop.xlane.xlu2 %355 }
 0x45c   :  { %v358_v38 = vsub.f32 %v348_v17, %v356_v37 }
 0x45e   :  { %v361_v41 = vmul.f32 1.442695, %v358_v38 }
 0x460   :  { %978 = vpow2.f32 %v361_v41 }
 0x463   :  { %v539_v22 = vpop.permute.xlu2 %538 }
 0x466   :  { %v1219_v42 = vpop.eup %978 }
 0x467   :  { %v366_v43 = vsel %vm142_vm8, %v1219_v42, 0.0 }
 0x468   :  { %367 = vadd.xlane.f32.xlu1 %v366_v43  ;;  %v1254_v43 = vpop.f32.mrf.mxu0 }
 0x481   :  { %540 = vrot.lane.b32.xlu1 %v1175_v40, %s1114_s5 }
 0x489   :  { %700 = vrot.lane.b32.xlu1 %v1172_v39, %s1115_s6 }
 0x491   :  { %726 = vrot.lane.b32.xlu1 %v1175_v40, %s1116_s7 }
 0x492   :  { %v365_v44 = vpop.xlane.xlu0 %364 }
 0x493   :  { %980 = vrcp.f32 %v365_v44  ;;  %v380_v48 = vand.u32 2147483648, %v365_v44  ;;  %v378_v50 = vand.u32 2147483647, %v365_v44  ;;  %vm374_vm3 = vweird.f32 %v365_v44 }
 0x495   :  { %v381_v53 = vor.u32 1.1754944e-38, %v380_v48  ;;  %vm379_vm5 = vcmp.eq.f32.partialorder %v378_v50, 8.507059e+37 }
 0x499   :  { %v981_v45 = vpop.eup %980 }
 0x49a   :  { %v370_v46 = vmul.f32 %v981_v45, %v365_v44  ;;  %vm375_vm2 = vweird.f32 %v981_v45  ;;  %v666_v44 = vld [vmem:[#allocation7 + $0x10] sm:$0xff] }
 0x49b   :  { %vm376_vm4 = vmor %vm374_vm3, %vm375_vm2  ;;  %688 = vmatpush.msrb.mxu2 %v666_v44 }
 0x49c   :  { %v371_v47 = vsub.f32 1.0, %v370_v46 }
 0x49e   :  { %v372_v49 = vmul.f32 %v981_v45, %v371_v47 }
 0x49f   :  { %v291_v51 = vpop.f32.mrf.mxu3 }
 0x4a0   :  { %v373_v52 = vadd.f32 %v981_v45, %v372_v49  ;;  %927 = vmatmul.msk.f32.gmra.mxu0 %vm142_vm8, %v291_v51 }
 0x4a2   :  { %v377_v54 = vsel %vm376_vm4, %v981_v45, %v373_v52 }
 0x4a3   :  { %v382_v55 = vsel %vm379_vm5, %v381_v53, %v377_v54 }
 0x4a4   :  { %v397_v56 = vmul.f32 %v977_v34, %v382_v55 }
 0x4a5   :  { %v513_v57 = vpop.permute.xlu0 %512 }
 0x4a6   :  { %922 = vmatmul.msk.f32.vlgmr.msrb.gmra.mxu3 %vm142_vm8, %v397_v56 }
 0x4a7   :  { %928 = vmatpush.xpose.msk.msra.mxu3 %vm142_vm8, %v513_v57 }
 0x4ae   :  { %929 = vmatmul.msk.f32.vlgmr.msra.gmra.mxu3 %vm142_vm8, %v511_v58 }
 0x4db   :  { %v368_v59 = vpop.xlane.xlu1 %367 }
 0x4dc   :  { %982 = vrcp.f32 %v368_v59  ;;  %v394_v12 = vand.u32 2147483648, %v368_v59  ;;  %vm388_vm7 = vweird.f32 %v368_v59  ;;  %v392_v14 = vand.u32 2147483647, %v368_v59 }
 0x4de   :  { %v395_v17 = vor.u32 1.1754944e-38, %v394_v12  ;;  %vm393_vm10 = vcmp.eq.f32.partialorder %v392_v14, 8.507059e+37 }
 0x4e2   :  { %v983_v4 = vpop.eup %982 }
 0x4e3   :  { %v384_v5 = vmul.f32 %v983_v4, %v368_v59  ;;  %vm389_vm6 = vweird.f32 %v983_v4 }
 0x4e4   :  { %vm390_vm9 = vmor %vm388_vm7, %vm389_vm6 }
 0x4e5   :  { %v385_v7 = vsub.f32 1.0, %v384_v5 }
 0x4e7   :  { %v386_v10 = vmul.f32 %v983_v4, %v385_v7 }
 0x4e9   :  { %v387_v11 = vadd.f32 %v983_v4, %v386_v10 }
 0x4eb   :  { %v391_v16 = vsel %vm390_vm9, %v983_v4, %v387_v11 }
 0x4ec   :  { %v396_v18 = vsel %vm393_vm10, %v395_v17, %v391_v16 }
 0x4ed   :  { %v398_v20 = vmul.f32 %v1219_v42, %v396_v18 }
 0x4f3   :  { %v541_v60 = vpop.permute.xlu1 %540 }
 0x4fb   :  { %v701_v61 = vpop.permute.xlu1 %700 }
 0x4fc   :  { %936 = vmatpush.xpose.msk.msra.mxu0 %vm142_vm8, %v701_v61 }
 0x503   :  { %v727_v41 = vpop.permute.xlu1 %726 }
 0x51d   :  { %v1256_v45 = vpop.f32.mrf.mxu0 }
 0x529   :  { %v422_v63 = vpop.f32.mrf.mxu3 }
 0x52a   :  { %924 = vmatmul.msk.f32.vlgmr.msra.gmra.mxu2 %vm142_vm8, %v422_v63 }
 0x531   :  { %v535_v2 = vpop.f32.mrf.mxu3 }
 0x532   :  { %v566_v3 = vsel %vm142_vm8, %v535_v2, -inf }
 0x533   :  { %567 = vmax.xlane.f32.xlu0 %v566_v3 }
 0x547   :  { %425 = vrot.lane.b32.xlu0 %v1175_v40, %s1113_s4 }
 0x54f   :  { %614 = vrot.lane.b32.xlu0 %v1172_v39, %s1117_s8 }
 0x557   :  { %728 = vrot.lane.b32.xlu0 %v1175_v40, %s1115_s6 }
 0x5a6   :  { %v568_v6 = vpop.xlane.xlu0 %567 }
 0x5a7   :  { %v572_v8 = vsub.f32 %v535_v2, %v568_v6 }
 0x5a9   :  { %v574_v9 = vmul.f32 1.442695, %v572_v8 }
 0x5ab   :  { %984 = vpow2.f32 %v574_v9 }
 0x5b1   :  { %v985_v13 = vpop.eup %984 }
 0x5b2   :  { %v578_v15 = vsel %vm142_vm8, %v985_v13, 0.0 }
 0x5b3   :  { %579 = vadd.xlane.f32.xlu2 %v578_v15 }
 0x5b9   :  { %v426_v19 = vpop.permute.xlu0 %425 }
 0x5ba   :  { %446 = vmatpush.msrb.mxu1 %v426_v19 }
 0x5bb   :  { %923 = vmatmul.msk.f32.vlgmr.msrb.gmra.mxu1 %vm142_vm8, %v398_v20 }
 0x5bc   :  { %930 = vmatpush.xpose.msk.msra.mxu1 %vm142_vm8, %v541_v60 }
 0x5c1   :  { %v615_v21 = vpop.permute.xlu0 %614 }
 0x5c2   :  { %635 = vmatpush.msrb.mxu3 %v615_v21 }
 0x5c3   :  { %931 = vmatmul.msk.f32.vlgmr.msra.gmra.mxu1 %vm142_vm8, %v539_v22 }
 0x5c9   :  { %v729_v23 = vpop.permute.xlu0 %728 }
 0x5ca   :  { %938 = vmatpush.xpose.msk.msra.mxu3 %vm142_vm8, %v729_v23 }
 0x5cb   :  { %698 = vrot.lane.b32.xlu2 %v1172_v39, %s1116_s7 }
 0x626   :  { %v580_v24 = vpop.xlane.xlu2 %579 }
 0x627   :  { %986 = vrcp.f32 %v580_v24  ;;  %v595_v29 = vand.u32 2147483648, %v580_v24  ;;  %v593_v31 = vand.u32 2147483647, %v580_v24  ;;  %vm589_vm12 = vweird.f32 %v580_v24 }
 0x629   :  { %v596_v33 = vor.u32 1.1754944e-38, %v595_v29  ;;  %vm594_vm14 = vcmp.eq.f32.partialorder %v593_v31, 8.507059e+37 }
 0x62d   :  { %v987_v25 = vpop.eup %986 }
 0x62e   :  { %v585_v26 = vmul.f32 %v987_v25, %v580_v24  ;;  %v699_v27 = vpop.permute.xlu2 %698  ;;  %vm590_vm11 = vweird.f32 %v987_v25 }
 0x62f   :  { %937 = vmatmul.msk.f32.vlgmr.msra.gmra.mxu0 %vm142_vm8, %v699_v27  ;;  %vm591_vm13 = vmor %vm589_vm12, %vm590_vm11 }
 0x630   :  { %v586_v28 = vsub.f32 1.0, %v585_v26 }
 0x632   :  { %v587_v30 = vmul.f32 %v987_v25, %v586_v28 }
 0x634   :  { %v588_v32 = vadd.f32 %v987_v25, %v587_v30 }
 0x636   :  { %v592_v34 = vsel %vm591_vm13, %v987_v25, %v588_v32 }
 0x637   :  { %v597_v35 = vsel %vm594_vm14, %v596_v33, %v592_v34 }
 0x638   :  { %v448_v36 = vpop.f32.mrf.mxu1  ;;  %v612_v37 = vmul.f32 %v985_v13, %v597_v35 }
 0x639   :  { %925 = vmatmul.msk.f32.gmra.mxu2 %vm142_vm8, %v448_v36 }
 0x63a   :  { %932 = vmatmul.msk.f32.vlgmr.msrb.gmra.mxu3 %vm142_vm8, %v612_v37 }
 0x640   :  { %v563_v38 = vpop.f32.mrf.mxu1 }
 0x641   :  { %v569_v42 = vsel %vm142_vm8, %v563_v38, -inf }
 0x642   :  { %570 = vmax.xlane.f32.xlu0 %v569_v42  ;;  %939 = vmatmul.msk.f32.vlgmr.msra.gmra.mxu3 %vm142_vm8, %v727_v41 }
 0x6ac   :  { %v723_v46 = vpop.f32.mrf.mxu0 }
 0x6ad   :  { %v754_v47 = vsel %vm142_vm8, %v723_v46, -inf }
 0x6ae   :  { %755 = vmax.xlane.f32.xlu2 %v754_v47 }
 0x6b5   :  { %v571_v48 = vpop.xlane.xlu0 %570 }
 0x6b6   :  { %v573_v49 = vsub.f32 %v563_v38, %v571_v48 }
 0x6b8   :  { %v576_v50 = vmul.f32 1.442695, %v573_v49  ;;  %v475_v49 = vpop.f32.mrf.mxu2 }
 0x6ba   :  { %988 = vpow2.f32 %v576_v50 }
 0x6bd   :  { %v637_v51 = vpop.f32.mrf.mxu3 }
 0x6be   :  { %934 = vmatmul.msk.f32.vlgmr.msrb.gmra.mxu2 %vm142_vm8, %v637_v51 }
 0x6c0   :  { %v989_v52 = vpop.eup %988  ;;  %v478_v50 = vpop.f32.mrf.mxu2 }
 0x6c1   :  { %v581_v53 = vsel %vm142_vm8, %v989_v52, 0.0 }
 0x6c2   :  { %582 = vadd.xlane.f32.xlu0 %v581_v53 }
 0x6c5   :  { %v751_v54 = vpop.f32.mrf.mxu3 }
 0x6c6   :  { %v757_v55 = vsel %vm142_vm8, %v751_v54, -inf }
 0x6c7   :  { %758 = vmax.xlane.f32.xlu1 %v757_v55 }
 0x6d6   :  { %640 = vrot.lane.b32.xlu0 %v1175_v40, %s1117_s8 }
 0x721   :  { %v756_v56 = vpop.xlane.xlu2 %755 }
 0x722   :  { %v760_v57 = vsub.f32 %v723_v46, %v756_v56  ;;  %v854_v46 = vld [vmem:[#allocation7 + $0x18] sm:$0xff] }
 0x723   :  { %876 = vmatpush.msrb.mxu3 %v854_v46 }
 0x724   :  { %v762_v58 = vmul.f32 1.442695, %v760_v57 }
 0x726   :  { %990 = vpow2.f32 %v762_v58  ;;  %v508_v58 = vadd.f32 %v1256_v45, %v478_v50 }
 0x72c   :  { %v991_v59 = vpop.eup %990 }
 0x72d   :  { %v766_v60 = vsel %vm142_vm8, %v991_v59, 0.0 }
 0x72e   :  { %767 = vadd.xlane.f32.xlu2 %v766_v60 }
 0x735   :  { %v583_v61 = vpop.xlane.xlu0 %582 }
 0x736   :  { %992 = vrcp.f32 %v583_v61  ;;  %v609_v6 = vand.u32 2147483648, %v583_v61  ;;  %v607_v8 = vand.u32 2147483647, %v583_v61  ;;  %vm603_vm1 = vweird.f32 %v583_v61 }
 0x738   :  { %v610_v10 = vor.u32 1.1754944e-38, %v609_v6  ;;  %vm608_vm3 = vcmp.eq.f32.partialorder %v607_v8, 8.507059e+37 }
 0x73a   :  { %v759_v62 = vpop.xlane.xlu1 %758 }
 0x73b   :  { %v761_v63 = vsub.f32 %v751_v54, %v759_v62 }
 0x73c   :  { %v993_v2 = vpop.eup %992 }
 0x73d   :  { %v599_v3 = vmul.f32 %v993_v2, %v583_v61  ;;  %v764_v4 = vmul.f32 1.442695, %v761_v63  ;;  %vm604_vm15 = vweird.f32 %v993_v2 }
 0x73e   :  { %vm605_vm2 = vmor %vm603_vm1, %vm604_vm15 }
 0x73f   :  { %v600_v5 = vsub.f32 1.0, %v599_v3  ;;  %994 = vpow2.f32 %v764_v4 }
 0x741   :  { %v601_v7 = vmul.f32 %v993_v2, %v600_v5  ;;  %v690_v51 = vpop.f32.mrf.mxu2 }
 0x743   :  { %v602_v9 = vadd.f32 %v993_v2, %v601_v7 }
 0x745   :  { %v995_v11 = vpop.eup %994  ;;  %v606_v12 = vsel %vm605_vm2, %v993_v2, %v602_v9 }
 0x746   :  { %v611_v13 = vsel %vm608_vm3, %v610_v10, %v606_v12  ;;  %802 = vrot.lane.b32.xlu2 %v1172_v39, %s1118_s9  ;;  %v769_v14 = vsel %vm142_vm8, %v995_v11, 0.0 }
 0x747   :  { %770 = vadd.xlane.f32.xlu1 %v769_v14  ;;  %v613_v15 = vmul.f32 %v989_v52, %v611_v13  ;;  %v505_v52 = vadd.f32 %v1254_v43, %v475_v49 }
 0x748   :  { %v641_v16 = vpop.permute.xlu0 %640 }
 0x749   :  { %661 = vmatpush.msrb.mxu1 %v641_v16  ;;  %v696_v53 = vadd.f32 %v690_v51, %v505_v52 }
 0x74a   :  { %933 = vmatmul.msk.f32.vlgmr.msrb.gmra.mxu1 %vm142_vm8, %v613_v15 }
 0x760   :  { %828 = vrot.lane.b32.xlu1 %v1175_v40, %s1118_s9 }
 0x7a1   :  { %v768_v17 = vpop.xlane.xlu2 %767 }
 0x7a2   :  { %996 = vrcp.f32 %v768_v17  ;;  %v783_v22 = vand.u32 2147483648, %v768_v17  ;;  %v781_v39 = vand.u32 2147483647, %v768_v17  ;;  %vm777_vm5 = vweird.f32 %v768_v17 }
 0x7a4   :  { %v784_v25 = vor.u32 1.1754944e-38, %v783_v22  ;;  %vm782_vm7 = vcmp.eq.f32.partialorder %v781_v39, 8.507059e+37 }
 0x7a8   :  { %v997_v18 = vpop.eup %996 }
 0x7a9   :  { %v773_v19 = vmul.f32 %v997_v18, %v768_v17  ;;  %v803_v20 = vpop.permute.xlu2 %802  ;;  %vm778_vm4 = vweird.f32 %v997_v18 }
 0x7aa   :  { %823 = vmatpush.msra.mxu1 %v803_v20  ;;  %vm779_vm6 = vmor %vm777_vm5, %vm778_vm4 }
 0x7ab   :  { %v774_v21 = vsub.f32 1.0, %v773_v19 }
 0x7ad   :  { %v775_v23 = vmul.f32 %v997_v18, %v774_v21 }
 0x7af   :  { %v776_v24 = vadd.f32 %v997_v18, %v775_v23 }
 0x7b1   :  { %v780_v26 = vsel %vm779_vm6, %v997_v18, %v776_v24 }
 0x7b2   :  { %v785_v27 = vsel %vm782_vm7, %v784_v25, %v780_v26 }
 0x7b3   :  { %v800_v28 = vmul.f32 %v991_v59, %v785_v27 }
 0x7b5   :  { %940 = vmatmul.msk.f32.vlgmr.msra.gmra.mxu1 %vm142_vm8, %v800_v28 }
 0x7ba   :  { %v771_v40 = vpop.xlane.xlu1 %770 }
 0x7bb   :  { %998 = vrcp.f32 %v771_v40  ;;  %v797_v35 = vand.u32 2147483648, %v771_v40  ;;  %vm791_vm10 = vweird.f32 %v771_v40  ;;  %v795_v36 = vand.u32 2147483647, %v771_v40 }
 0x7bd   :  { %v798_v38 = vor.u32 1.1754944e-38, %v797_v35  ;;  %vm796_vm12 = vcmp.eq.f32.partialorder %v795_v36, 8.507059e+37 }
 0x7c1   :  { %v999_v29 = vpop.eup %998 }
 0x7c2   :  { %v787_v30 = vmul.f32 %v999_v29, %v771_v40  ;;  %vm792_vm9 = vweird.f32 %v999_v29 }
 0x7c3   :  { %vm793_vm11 = vmor %vm791_vm10, %vm792_vm9 }
 0x7c4   :  { %v788_v31 = vsub.f32 1.0, %v787_v30 }
 0x7c6   :  { %v789_v32 = vmul.f32 %v999_v29, %v788_v31 }
 0x7c7   :  { %v663_v33 = vpop.f32.mrf.mxu1 }
 0x7c8   :  { %v790_v34 = vadd.f32 %v999_v29, %v789_v32  ;;  %935 = vmatmul.msk.f32.gmra.mxu2 %vm142_vm8, %v663_v33 }
 0x7ca   :  { %v794_v37 = vsel %vm793_vm11, %v999_v29, %v790_v34 }
 0x7cb   :  { %v799_v41 = vsel %vm796_vm12, %v798_v38, %v794_v37 }
 0x7cc   :  { %v801_v44 = vmul.f32 %v995_v11, %v799_v41 }
 0x7d2   :  { %v829_v42 = vpop.permute.xlu1 %828 }
 0x7d3   :  { %849 = vmatpush.msrb.mxu0 %v829_v42 }
 0x7d4   :  { %941 = vmatmul.msk.f32.vlgmr.msrb.gmra.mxu0 %vm142_vm8, %v801_v44 }
 0x832   :  { %v825_v47 = vpop.f32.mrf.mxu1 }
 0x833   :  { %942 = vmatmul.msk.f32.vlgmr.msrb.gmra.mxu3 %vm142_vm8, %v825_v47 }
 0x84b   :  { %v693_v57 = vpop.f32.mrf.mxu2 }
 0x84c   :  { %v697_v59 = vadd.f32 %v693_v57, %v508_v58 }
 0x851   :  { %v851_v48 = vpop.f32.mrf.mxu0 }
 0x852   :  { %943 = vmatmul.msk.f32.gmra.mxu3 %vm142_vm8, %v851_v48 }
 0x8b6   :  { %v878_v54 = vpop.f32.mrf.mxu3 }
 0x8b7   :  { %v884_v55 = vadd.f32 %v878_v54, %v696_v53 }
 0x8b9   :  { %v886_v56 = vadd.f32 %v884_v55, %v1158_v0 }
 0x8bb   :  { %888 = vst.msk [vmem:[#allocation8] sm:$0xff] %vm66_vm0, %v886_v56 }
 0x8d5   :  { %v881_v60 = vpop.f32.mrf.mxu3 }
 0x8d6   :  { %v885_v61 = vadd.f32 %v881_v60, %v697_v59 }
 0x8d8   :  { %v887_v43 = vadd.f32 %v885_v61, %v1160_v1 }
 0x8da   :  { %889 = vst.msk [vmem:[#allocation8 + $0x8] sm:$0xff] %vm66_vm0, %v887_v43 }
 0x8db   :  { %902 = dma.vmem_to_hbm [thread:$0]  %s895_s11, 256, %s897_s14, [#allocation4], %s1103_s20, %s1103_s20, %s1104_s21  }
 0x8dc   :  { %1100 = dma.done.wait [#allocation4], 256  }
 0x8dd   :  { %1101 = vsyncadd [#allocation4], 4294967040 }
 0x8de   :  { %907 = vsyncpa [#allocation3], 1 }
 0x8df   :  { %908 = vsyncpa [#allocation6], 1 }
 0x8e0   :  { %909 = vsyncpa [#allocation4], 1 }

</bundles_post_ra>
